<compile_context>
chip_gen: v6e
topology: v6e:2x2x1
jax: 0.10.0
libtpu: 0.0.40
codegen_flags: <defaults>
</compile_context>

<pallas_src>
import functools

import jax
import jax.numpy as jnp
from jax.experimental import pallas as pl
from jax.experimental.pallas import tpu as pltpu


# ------------------------------------------------------------------ helpers

def _choose_batch_tile(batch, target):
    """Largest divisor of `batch` <= target, preferring >= 2 grid steps."""
    target = max(1, min(target, batch))
    best = 1
    for d in range(1, batch + 1):
        if batch % d != 0 or d > target:
            continue
        if d == batch and batch > 1:   # keep >= 2 grid steps for dual-TC chips
            continue
        best = d
    return best


# ------------------------------------------------------------------ kernels

def _self_attn_kernel(feat_ref, mask_ref, len_ref, wqkv_ref, out_ref, *,
                      num_layers, embedding_size):
    """Bt batch elements per step: num_layers encoder layers + sum/len pooling."""
    E = embedding_size
    f = feat_ref[...].astype(jnp.float32)                 # (Bt, S, E)
    key_pad = mask_ref[...] > 0.5                         # (Bt, 1, S) True=padded key
    scale = jnp.float32(E ** (-0.5))
    bt, s, _ = f.shape

    for layer in range(num_layers):                       # static unroll
        w = wqkv_ref[layer]                               # (E, 3E) = [Wq^T|Wk^T|Wv^T]
        qkv = jnp.dot(f.reshape(bt * s, E), w,
                      preferred_element_type=jnp.float32).reshape(bt, s, 3 * E)
        q = qkv[:, :, :E]
        k = qkv[:, :, E:2 * E]
        v = qkv[:, :, 2 * E:]
        # conf['component'] == ['w_v'] => no LayerNorm, v uses w_v
        attn = jnp.einsum('bqe,bke->bqk', q * scale, k,
                          preferred_element_type=jnp.float32)        # (Bt, S, S)
        # masked_fill(mask.unsqueeze(-2), -1e9): mask over the key axis.
        attn = jnp.where(key_pad, jnp.float32(-1.0e9), attn)
        attn = attn - jnp.max(attn, axis=-1, keepdims=True)
        attn = jnp.exp(attn)
        # exact reciprocal kept for bit-level parity (approx=True -> EUP win)
        attn = attn * pl.reciprocal(jnp.sum(attn, axis=-1, keepdims=True),
                                    approx=False)
        f = jnp.einsum('bqk,bke->bqe', attn, v,
                       preferred_element_type=jnp.float32)           # (Bt, S, E)

    pooled = jnp.sum(f, axis=1, keepdims=True)            # (Bt, 1, E)
    inv_len = pl.reciprocal(len_ref[...], approx=False)   # (Bt, 1, 1)
    out_ref[...] = (pooled * inv_len).astype(out_ref.dtype)


def _masked_mean_kernel(feat_ref, mask_ref, len_ref, out_ref):
    """'average': mask-fill-zero, sum over seq, divide by length. Bt per step."""
    f = feat_ref[...].astype(jnp.float32)                 # (Bt, S, E)
    f = jnp.where(mask_ref[...] > 0.5, jnp.float32(0.0), f)   # (Bt,S,1) bcast
    pooled = jnp.sum(f, axis=1, keepdims=True)            # (Bt, 1, E)
    out_ref[...] = (pooled * pl.reciprocal(len_ref[...], approx=False)
                    ).astype(out_ref.dtype)


def _soft_weighted_mean_kernel(feat_ref, w_ref, mask_ref, len_ref, out_ref):
    """'soft_weight': per-track weight, mask-fill-zero, sum / length."""
    f = feat_ref[...].astype(jnp.float32) * w_ref[...].astype(jnp.float32)
    f = jnp.where(mask_ref[...] > 0.5, jnp.float32(0.0), f)
    pooled = jnp.sum(f, axis=1, keepdims=True)
    out_ref[...] = (pooled * pl.reciprocal(len_ref[...], approx=False)
                    ).astype(out_ref.dtype)


# ----------------------------------------------------------------- wrapper

_VMEM_LIMIT = 48 * 1024 * 1024


class PlaylistConstructor:
    def __init__(self, conf, key):
        self.method = conf['method']
        self.num_layers = conf.get('num_layers', 1)
        self.embedding_size = conf['embedding_size']
        E, L = self.embedding_size, self.num_layers

        if self.method == 'soft_weight':
            self.num_tracks = conf['num_tracks']
            # torch.nn.init.ones_ on nn.Embedding(num_tracks, 1)
            self.soft_weights = jnp.ones((self.num_tracks, 1), jnp.float32)
        elif self.method == 'self_attn':
            # xavier_normal_: std = sqrt(2 / (fan_in + fan_out)) = 1/sqrt(E)
            std = (2.0 / (E + E)) ** 0.5
            kq, kk, kv = jax.random.split(key, 3)
            self.wq = std * jax.random.normal(kq, (L, E, E), jnp.float32)
            self.wk = std * jax.random.normal(kk, (L, E, E), jnp.float32)
            self.wv = std * jax.random.normal(kv, (L, E, E), jnp.float32)

    def _fused_qkv(self):
        # Pre-transposed ([in, out]) and fused along out: (L, E, 3E).
        return jnp.concatenate(
            [jnp.swapaxes(self.wq, 1, 2),
             jnp.swapaxes(self.wk, 1, 2),
             jnp.swapaxes(self.wv, 1, 2)], axis=2)

    def __call__(self, track_idx_seq, track_feat_seq, mask, length):
        B, S, E = track_feat_seq.shape
        len_f = length.astype(jnp.float32).reshape(B, 1, 1)

        if self.method == 'self_attn':
            L = self.num_layers
            bt = _choose_batch_tile(B, max(1, 256 // S))   # Bt*S rows per matmul
            mask_key = mask.astype(jnp.float32).reshape(B, 1, S)
            w_qkv = self._fused_qkv()
            kernel = functools.partial(
                _self_attn_kernel, num_layers=L, embedding_size=E)
            out = pl.pallas_call(
                kernel,
                out_shape=jax.ShapeDtypeStruct((B, 1, E), track_feat_seq.dtype),
                grid_spec=pltpu.PrefetchScalarGridSpec(
                    num_scalar_prefetch=0,
                    grid=(B // bt,),
                    in_specs=[
                        pl.BlockSpec((bt, S, E), lambda b: (b, 0, 0)),
                        pl.BlockSpec((bt, 1, S), lambda b: (b, 0, 0)),
                        pl.BlockSpec((bt, 1, 1), lambda b: (b, 0, 0)),
                        pl.BlockSpec((L, E, 3 * E), lambda b: (0, 0, 0)),
                    ],
                    out_specs=pl.BlockSpec((bt, 1, E), lambda b: (b, 0, 0)),
                ),
                compiler_params=pltpu.CompilerParams(
                    dimension_semantics=("parallel",),
                    vmem_limit_bytes=_VMEM_LIMIT),
            )(track_feat_seq, mask_key, len_f, w_qkv)
            return out.reshape(B, E)

        # 'average' / 'soft_weight': masked (weighted) mean pooling.
        bt = _choose_batch_tile(B, 128)
        mask_seq = mask.astype(jnp.float32).reshape(B, S, 1)

        if self.method == 'soft_weight':
            # embedding lookup (plain-JAX glue): soft_weights[idx] -> (B, S, 1)
            w_seq = jnp.take(self.soft_weights, track_idx_seq.reshape(-1),
                             axis=0).reshape(B, S, 1)
            out = pl.pallas_call(
                _soft_weighted_mean_kernel,
                out_shape=jax.ShapeDtypeStruct((B, 1, E), track_feat_seq.dtype),
                grid_spec=pltpu.PrefetchScalarGridSpec(
                    num_scalar_prefetch=0,
                    grid=(B // bt,),
                    in_specs=[
                        pl.BlockSpec((bt, S, E), lambda b: (b, 0, 0)),
                        pl.BlockSpec((bt, S, 1), lambda b: (b, 0, 0)),
                        pl.BlockSpec((bt, S, 1), lambda b: (b, 0, 0)),
                        pl.BlockSpec((bt, 1, 1), lambda b: (b, 0, 0)),
                    ],
                    out_specs=pl.BlockSpec((bt, 1, E), lambda b: (b, 0, 0)),
                ),
                compiler_params=pltpu.CompilerParams(
                    dimension_semantics=("parallel",),
                    vmem_limit_bytes=_VMEM_LIMIT),
            )(track_feat_seq, w_seq, mask_seq, len_f)
            return out.reshape(B, E)

        # 'average' — no weight stream at all.
        out = pl.pallas_call(
            _masked_mean_kernel,
            out_shape=jax.ShapeDtypeStruct((B, 1, E), track_feat_seq.dtype),
            grid_spec=pltpu.PrefetchScalarGridSpec(
                num_scalar_prefetch=0,
                grid=(B // bt,),
                in_specs=[
                    pl.BlockSpec((bt, S, E), lambda b: (b, 0, 0)),
                    pl.BlockSpec((bt, S, 1), lambda b: (b, 0, 0)),
                    pl.BlockSpec((bt, 1, 1), lambda b: (b, 0, 0)),
                ],
                out_specs=pl.BlockSpec((bt, 1, E), lambda b: (b, 0, 0)),
            ),
            compiler_params=pltpu.CompilerParams(
                dimension_semantics=("parallel",),
                vmem_limit_bytes=_VMEM_LIMIT),
        )(track_feat_seq, mask_seq, len_f)
        return out.reshape(B, E)


# ---------------------------------------------------------- pure-JAX refs

def _self_attn_ref(feat, mask, length, wq, wk, wv):
    f = feat
    E = f.shape[-1]
    scale = E ** (-0.5)
    for layer in range(wq.shape[0]):
        q = f @ wq[layer].T
        k = f @ wk[layer].T
        v = f @ wv[layer].T
        attn = (q * scale) @ jnp.swapaxes(k, -1, -2)
        attn = jnp.where(mask[:, None, :], -1.0e9, attn)
        attn = jax.nn.softmax(attn, axis=-1)
        f = attn @ v
    return jnp.sum(f, axis=-2) / length[:, None]


def _average_ref(feat, mask, length):
    f = jnp.where(mask[:, :, None], 0.0, feat)
    return jnp.sum(f, axis=-2) / length[:, None]


def _soft_weight_ref(feat, idx, weights, mask, length):
    w = weights[idx]                       # (B, S, 1)
    f = w * feat
    f = jnp.where(mask[:, :, None], 0.0, f)
    return jnp.sum(f, axis=-2) / length[:, None]


# -------------------------------------------------------------------- main

if __name__ == "__main__":
    B, S, E = 8, 8, 32
    key = jax.random.PRNGKey(0)
    k_feat, k_idx, k_len, k_param, k_sw = jax.random.split(key, 5)

    track_feat_seq = jax.random.normal(k_feat, (B, S, E), jnp.float32)
    track_idx_seq = jax.random.randint(k_idx, (B, S), 0, 16)
    lengths = jax.random.randint(k_len, (B,), 1, S + 1)
    mask = jnp.arange(S)[None, :] >= lengths[:, None]          # True = padded
    length = lengths.astype(jnp.float32)

    # ---- self_attn method (two stacked encoder layers) ----
    conf_attn = {
        'method': 'self_attn', 'device': 'tpu', 'embedding_size': E,
        'num_layers': 2, 'component': ['w_v'],
    }
    model_attn = PlaylistConstructor(conf_attn, k_param)
    out_attn = jax.block_until_ready(
        model_attn(track_idx_seq, track_feat_seq, mask, length))
    ref_attn = _self_attn_ref(track_feat_seq, mask, length,
                              model_attn.wq, model_attn.wk, model_attn.wv)
    assert out_attn.shape == (B, E)
    assert jnp.allclose(out_attn, ref_attn, rtol=1e-4, atol=1e-4), \
        float(jnp.max(jnp.abs(out_attn - ref_attn)))

    # ---- average method ----
    conf_avg = {'method': 'average', 'device': 'tpu', 'embedding_size': E}
    model_avg = PlaylistConstructor(conf_avg, k_param)
    out_avg = jax.block_until_ready(
        model_avg(track_idx_seq, track_feat_seq, mask, length))
    ref_avg = _average_ref(track_feat_seq, mask, length)
    assert jnp.allclose(out_avg, ref_avg, rtol=1e-5, atol=1e-5)

    # ---- soft_weight method (ones init => same as average) ----
    conf_sw = {'method': 'soft_weight', 'device': 'tpu',
               'embedding_size': E, 'num_tracks': 16}
    model_sw = PlaylistConstructor(conf_sw, k_param)
    out_sw = jax.block_until_ready(
        model_sw(track_idx_seq, track_feat_seq, mask, length))
    assert jnp.allclose(out_sw, ref_avg, rtol=1e-5, atol=1e-5)

    # ---- soft_weight with non-trivial weights ----
    model_sw.soft_weights = jax.random.uniform(
        k_sw, (16, 1), jnp.float32, 0.5, 1.5)
    out_sw2 = jax.block_until_ready(
        model_sw(track_idx_seq, track_feat_seq, mask, length))
    ref_sw2 = _soft_weight_ref(track_feat_seq, track_idx_seq,
                               model_sw.soft_weights, mask, length)
    assert jnp.allclose(out_sw2, ref_sw2, rtol=1e-5, atol=1e-5)

    print("KERNEL_OK")
</pallas_src>

<mosaic_0001>
module attributes {stable_mosaic.version = 11 : i64} {
  func.func @_self_attn_kernel(%arg0: i32, %arg1: memref<4x8x32xf32, #tpu.memory_space<vmem>>, %arg2: memref<4x1x8xf32, #tpu.memory_space<vmem>>, %arg3: memref<4x1x1xf32, #tpu.memory_space<vmem>>, %arg4: memref<2x32x96xf32, #tpu.memory_space<vmem>>, %arg5: memref<4x1x32xf32, #tpu.memory_space<vmem>>) attributes {dimension_semantics = [#tpu.dimension_semantics<parallel>], iteration_bounds = array<i64: 2>, scalar_prefetch = 0 : i64, scratch_operands = 0 : i64, tpu.core_type = #tpu.core_type<tc>, window_params = [{transform_indices = @transform_0, window_bounds = array<i64: 4, 8, 32>}, {transform_indices = @transform_1, window_bounds = array<i64: 4, 1, 8>}, {transform_indices = @transform_2, window_bounds = array<i64: 4, 1, 1>}, {pipeline_mode = #tpu.pipeline_mode<synchronous>, transform_indices = @transform_3, window_bounds = array<i64: 2, 32, 96>}, {transform_indices = @transform_4, window_bounds = array<i64: 4, 1, 32>}]} {
    %c0 = arith.constant 0 : index
    %c0_0 = arith.constant 0 : index
    %c0_1 = arith.constant 0 : index
    %0 = vector.load %arg1[%c0, %c0_0, %c0_1] : memref<4x8x32xf32, #tpu.memory_space<vmem>>, vector<4x8x32xf32>
    %c0_2 = arith.constant 0 : index
    %c0_3 = arith.constant 0 : index
    %c0_4 = arith.constant 0 : index
    %1 = vector.load %arg2[%c0_2, %c0_3, %c0_4] : memref<4x1x8xf32, #tpu.memory_space<vmem>>, vector<4x1x8xf32>
    %cst = arith.constant 5.000000e-01 : f32
    %2 = vector.broadcast %cst : f32 to vector<4x1x8xf32>
    %3 = arith.cmpf ogt, %1, %2 : vector<4x1x8xf32>
    %c0_5 = arith.constant 0 : index
    %c0_6 = arith.constant 0 : index
    %c0_7 = arith.constant 0 : index
    %4 = vector.load %arg4[%c0_5, %c0_6, %c0_7] : memref<2x32x96xf32, #tpu.memory_space<vmem>>, vector<1x32x96xf32>
    %5 = vector.shape_cast %4 : vector<1x32x96xf32> to vector<32x96xf32>
    %6 = vector.shape_cast %0 : vector<4x8x32xf32> to vector<32x32xf32>
    %cst_8 = arith.constant dense<0.000000e+00> : vector<32x96xf32>
    %7 = tpu.matmul %6, %5, %cst_8 {dimension_numbers = #tpu.dot_dimension_numbers<[1], [0], [0], [1], [0, 0, 1, 1], [], []>} : vector<32x32xf32>, vector<32x96xf32>, vector<32x96xf32> -> vector<32x96xf32>
    %8 = vector.shape_cast %7 : vector<32x96xf32> to vector<4x8x96xf32>
    %9 = vector.extract_strided_slice %8 {offsets = [0, 0, 0], sizes = [4, 8, 32], strides = [1, 1, 1]} : vector<4x8x96xf32> to vector<4x8x32xf32>
    %10 = vector.extract_strided_slice %8 {offsets = [0, 0, 32], sizes = [4, 8, 32], strides = [1, 1, 1]} : vector<4x8x96xf32> to vector<4x8x32xf32>
    %11 = vector.extract_strided_slice %8 {offsets = [0, 0, 64], sizes = [4, 8, 32], strides = [1, 1, 1]} : vector<4x8x96xf32> to vector<4x8x32xf32>
    %cst_9 = arith.constant 0.176776692 : f32
    %12 = vector.broadcast %cst_9 : f32 to vector<4x8x32xf32>
    %13 = arith.mulf %9, %12 : vector<4x8x32xf32>
    "tpu.trace_start"() <{level = 10 : i32, message = "bqe,bke->bqk"}> : () -> ()
    %cst_10 = arith.constant dense<0.000000e+00> : vector<4x8x8xf32>
    %14 = tpu.matmul %13, %10, %cst_10 {dimension_numbers = #tpu.dot_dimension_numbers<[2], [2], [1], [1], [0, 0, 0, 1, 1, 1], [0], [0]>} : vector<4x8x32xf32>, vector<4x8x32xf32>, vector<4x8x8xf32> -> vector<4x8x8xf32>
    %cst_11 = arith.constant -1.000000e+09 : f32
    "tpu.trace_stop"() : () -> ()
    %15 = vector.shape_cast %3 : vector<4x1x8xi1> to vector<4x1x8xi1>
    %16 = vector.broadcast %15 : vector<4x1x8xi1> to vector<4x8x8xi1>
    %17 = vector.broadcast %cst_11 : f32 to vector<4x8x8xf32>
    %18 = arith.select %16, %17, %14 : vector<4x8x8xi1>, vector<4x8x8xf32>
    %cst_12 = arith.constant dense<0xFF800000> : vector<4x8xf32>
    %19 = vector.multi_reduction <maximumf>, %18, %cst_12 [2] : vector<4x8x8xf32> to vector<4x8xf32>
    %20 = vector.shape_cast %19 : vector<4x8xf32> to vector<4x8x1xf32>
    %21 = vector.broadcast %20 : vector<4x8x1xf32> to vector<4x8x8xf32>
    %22 = arith.subf %18, %21 : vector<4x8x8xf32>
    %23 = math.exp %22 : vector<4x8x8xf32>
    %cst_13 = arith.constant dense<0.000000e+00> : vector<4x8xf32>
    %24 = vector.multi_reduction <add>, %23, %cst_13 [2] : vector<4x8x8xf32> to vector<4x8xf32>
    %25 = vector.shape_cast %24 : vector<4x8xf32> to vector<4x8x1xf32>
    %26 = tpu.reciprocal %25 : vector<4x8x1xf32> -> vector<4x8x1xf32>
    %27 = vector.broadcast %26 : vector<4x8x1xf32> to vector<4x8x8xf32>
    %28 = arith.mulf %23, %27 : vector<4x8x8xf32>
    "tpu.trace_start"() <{level = 10 : i32, message = "bqk,bke->bqe"}> : () -> ()
    %cst_14 = arith.constant dense<0.000000e+00> : vector<4x8x32xf32>
    %29 = tpu.matmul %28, %11, %cst_14 {dimension_numbers = #tpu.dot_dimension_numbers<[2], [1], [1], [2], [0, 0, 0, 1, 1, 2], [0], [0]>} : vector<4x8x8xf32>, vector<4x8x32xf32>, vector<4x8x32xf32> -> vector<4x8x32xf32>
    "tpu.trace_stop"() : () -> ()
    %c1 = arith.constant 1 : index
    %c0_15 = arith.constant 0 : index
    %c0_16 = arith.constant 0 : index
    %30 = vector.load %arg4[%c1, %c0_15, %c0_16] : memref<2x32x96xf32, #tpu.memory_space<vmem>>, vector<1x32x96xf32>
    %31 = vector.shape_cast %30 : vector<1x32x96xf32> to vector<32x96xf32>
    %32 = vector.shape_cast %29 : vector<4x8x32xf32> to vector<32x32xf32>
    %cst_17 = arith.constant dense<0.000000e+00> : vector<32x96xf32>
    %33 = tpu.matmul %32, %31, %cst_17 {dimension_numbers = #tpu.dot_dimension_numbers<[1], [0], [0], [1], [0, 0, 1, 1], [], []>} : vector<32x32xf32>, vector<32x96xf32>, vector<32x96xf32> -> vector<32x96xf32>
    %34 = vector.shape_cast %33 : vector<32x96xf32> to vector<4x8x96xf32>
    %35 = vector.extract_strided_slice %34 {offsets = [0, 0, 0], sizes = [4, 8, 32], strides = [1, 1, 1]} : vector<4x8x96xf32> to vector<4x8x32xf32>
    %36 = vector.extract_strided_slice %34 {offsets = [0, 0, 32], sizes = [4, 8, 32], strides = [1, 1, 1]} : vector<4x8x96xf32> to vector<4x8x32xf32>
    %37 = vector.extract_strided_slice %34 {offsets = [0, 0, 64], sizes = [4, 8, 32], strides = [1, 1, 1]} : vector<4x8x96xf32> to vector<4x8x32xf32>
    %cst_18 = arith.constant 0.176776692 : f32
    %38 = vector.broadcast %cst_18 : f32 to vector<4x8x32xf32>
    %39 = arith.mulf %35, %38 : vector<4x8x32xf32>
    "tpu.trace_start"() <{level = 10 : i32, message = "bqe,bke->bqk"}> : () -> ()
    %cst_19 = arith.constant dense<0.000000e+00> : vector<4x8x8xf32>
    %40 = tpu.matmul %39, %36, %cst_19 {dimension_numbers = #tpu.dot_dimension_numbers<[2], [2], [1], [1], [0, 0, 0, 1, 1, 1], [0], [0]>} : vector<4x8x32xf32>, vector<4x8x32xf32>, vector<4x8x8xf32> -> vector<4x8x8xf32>
    %cst_20 = arith.constant -1.000000e+09 : f32
    "tpu.trace_stop"() : () -> ()
    %41 = vector.shape_cast %3 : vector<4x1x8xi1> to vector<4x1x8xi1>
    %42 = vector.broadcast %41 : vector<4x1x8xi1> to vector<4x8x8xi1>
    %43 = vector.broadcast %cst_20 : f32 to vector<4x8x8xf32>
    %44 = arith.select %42, %43, %40 : vector<4x8x8xi1>, vector<4x8x8xf32>
    %cst_21 = arith.constant dense<0xFF800000> : vector<4x8xf32>
    %45 = vector.multi_reduction <maximumf>, %44, %cst_21 [2] : vector<4x8x8xf32> to vector<4x8xf32>
    %46 = vector.shape_cast %45 : vector<4x8xf32> to vector<4x8x1xf32>
    %47 = vector.broadcast %46 : vector<4x8x1xf32> to vector<4x8x8xf32>
    %48 = arith.subf %44, %47 : vector<4x8x8xf32>
    %49 = math.exp %48 : vector<4x8x8xf32>
    %cst_22 = arith.constant dense<0.000000e+00> : vector<4x8xf32>
    %50 = vector.multi_reduction <add>, %49, %cst_22 [2] : vector<4x8x8xf32> to vector<4x8xf32>
    %51 = vector.shape_cast %50 : vector<4x8xf32> to vector<4x8x1xf32>
    %52 = tpu.reciprocal %51 : vector<4x8x1xf32> -> vector<4x8x1xf32>
    %53 = vector.broadcast %52 : vector<4x8x1xf32> to vector<4x8x8xf32>
    %54 = arith.mulf %49, %53 : vector<4x8x8xf32>
    "tpu.trace_start"() <{level = 10 : i32, message = "bqk,bke->bqe"}> : () -> ()
    %cst_23 = arith.constant dense<0.000000e+00> : vector<4x8x32xf32>
    %55 = tpu.matmul %54, %37, %cst_23 {dimension_numbers = #tpu.dot_dimension_numbers<[2], [1], [1], [2], [0, 0, 0, 1, 1, 2], [0], [0]>} : vector<4x8x8xf32>, vector<4x8x32xf32>, vector<4x8x32xf32> -> vector<4x8x32xf32>
    "tpu.trace_stop"() : () -> ()
    %cst_24 = arith.constant dense<0.000000e+00> : vector<4x32xf32>
    %56 = vector.multi_reduction <add>, %55, %cst_24 [1] : vector<4x8x32xf32> to vector<4x32xf32>
    %57 = vector.shape_cast %56 : vector<4x32xf32> to vector<4x1x32xf32>
    %c0_25 = arith.constant 0 : index
    %c0_26 = arith.constant 0 : index
    %c0_27 = arith.constant 0 : index
    %58 = vector.load %arg3[%c0_25, %c0_26, %c0_27] : memref<4x1x1xf32, #tpu.memory_space<vmem>>, vector<4x1x1xf32>
    %59 = tpu.reciprocal %58 : vector<4x1x1xf32> -> vector<4x1x1xf32>
    %60 = vector.broadcast %59 : vector<4x1x1xf32> to vector<4x1x32xf32>
    %61 = arith.mulf %57, %60 : vector<4x1x32xf32>
    %c0_28 = arith.constant 0 : index
    %c0_29 = arith.constant 0 : index
    %c0_30 = arith.constant 0 : index
    %62 = vector.load %arg5[%c0_28, %c0_29, %c0_30] : memref<4x1x32xf32, #tpu.memory_space<vmem>>, vector<4x1x32xf32>
    tpu.vector_store %arg5[%c0_28, %c0_29, %c0_30], %61 {strides = array<i32>} : memref<4x1x32xf32, #tpu.memory_space<vmem>>, vector<4x1x32xf32>,
    return
  }
  func.func @transform_0(%arg0: i32) -> (i32, i32, i32) {
    %c0_i32 = arith.constant 0 : i32
    %c0_i32_0 = arith.constant 0 : i32
    %c0_i32_1 = arith.constant 0 : i32
    return %arg0, %c0_i32, %c0_i32_0 : i32, i32, i32
  }
  func.func @transform_1(%arg0: i32) -> (i32, i32, i32) {
    %c0_i32 = arith.constant 0 : i32
    %c0_i32_0 = arith.constant 0 : i32
    %c0_i32_1 = arith.constant 0 : i32
    return %arg0, %c0_i32, %c0_i32_0 : i32, i32, i32
  }
  func.func @transform_2(%arg0: i32) -> (i32, i32, i32) {
    %c0_i32 = arith.constant 0 : i32
    %c0_i32_0 = arith.constant 0 : i32
    %c0_i32_1 = arith.constant 0 : i32
    return %arg0, %c0_i32, %c0_i32_0 : i32, i32, i32
  }
  func.func @transform_3(%arg0: i32) -> (i32, i32, i32) {
    %c0_i32 = arith.constant 0 : i32
    %c0_i32_0 = arith.constant 0 : i32
    %c0_i32_1 = arith.constant 0 : i32
    %c0_i32_2 = arith.constant 0 : i32
    return %c0_i32, %c0_i32_0, %c0_i32_1 : i32, i32, i32
  }
  func.func @transform_4(%arg0: i32) -> (i32, i32, i32) {
    %c0_i32 = arith.constant 0 : i32
    %c0_i32_0 = arith.constant 0 : i32
    %c0_i32_1 = arith.constant 0 : i32
    return %arg0, %c0_i32, %c0_i32_0 : i32, i32, i32
  }
}

</mosaic_0001>

<bundles_post_ra>
// kernel: tpu_custom_call.1
= control target key start
LH: loop header
LB: loop body
LE: loop exit
PB: predicated region body
PF: predicated region fallthrough
CT: control target
= control target key end

     0   :  { %9 = vsyncpa [#allocation3], 0  ;;  %s2915_s0 = inlined_call_operand.hbm [shape: f32[8,8,32], index: 0, kind: input, shape index: {}]   ;;  %s2916_s1 = inlined_call_operand.vmem [shape: f32[8,1,8], index: 1, kind: input, shape index: {}]   ;;  %s2917_s2 = inlined_call_operand.vmem [shape: f32[8,1,1], index: 2, kind: input, shape index: {}]   ;;  %s2918_s3 = inlined_call_operand.hbm [shape: f32[2,32,96], index: 3, kind: input, shape index: {}]   ;;  %s2919_s4 = inlined_call_operand.hbm [shape: f32[8,1,32], index: 4, kind: output, shape index: {}]  }
   0x1   :  { %11 = vsyncpa [#allocation3 + $0x1], 0 }
   0x2   :  { %12 = vsyncpa [#allocation6], 0 }
   0x3   :  { %13 = vsyncpa [#allocation4], 0 }
   0x4   :  { %15 = vsyncpa [#allocation4 + $0x1], 0  ;;  %s2521_s15 = smov 0   ;;  %s2523_s16 = smov 0  }
   0x5   :  { %s2525_s17 = smov 0   ;;  %s2527_s18 = smov 0  }
   0x6 LB: > { %s2542_s19 = sadd.s32 4294967295, %s2482_s18   ;;  %s2044_s20 = sadd.s32 4294967294, %s2482_s18   ;;  %s2482_s18 = sphi %s2527_s18, %s2949_s18   ;;  %s2478_s17 = sphi %s2525_s17, %s2948_s17   ;;  %s2474_s16 = sphi %s2523_s16, %s2947_s16   ;;  %s2470_s15 = sphi %s2521_s15, %s2946_s15  }
   0x7   : > { %p41_p0 = scmp.ne.s32.totalorder %s2474_s16, %s2470_s15  ;;  %p2920_p1 = scmp.eq.s32.totalorder %s2542_s19, 0 }
   0x8   : > { %p144_p3 = scmp.eq.s32.totalorder %s2044_s20, 1  ;;  %p2045_p5 = scmp.ge.s32.totalorder %s2482_s18, 1 }
   0x9   : > { %p2551_p4 = por %p2920_p1, %p41_p0  ;;  %p151_p7 = scmp.lt.s32.totalorder %s2482_s18, 3 }
   0xa   : > { %p2556_p6 = por %p144_p3, %p41_p0  ;;  %s2484_s24 = smov [#allocation5]  }
   0xb   : > { %s2924_s21 = scalar_select %p2551_p4, 1, 0 }
   0xc   : > { %s2925_s22 = scalar_select %p2556_p6, 1, 0 }
   0xd   : > { %p2561_p8 = pnand %p2045_p5, %p151_p7  ;;  %s163_s25 = sshll.u32 %s2484_s24, 4  ;;  %s164_s25 = int_to_ptr.vmem [resolvable:$true] %s163_s25 }
   0xe   : > { %s2575_s27 = sadd.s32 1, %s2482_s18   ;;  %s28_s28 = sadd.s32 1, %s2478_s17 }
   0xf   : > { %s2926_s23 = scalar_select %p2561_p8, 1, 0 }
  0x10   : > { %p2260_p9 = pneg %p2561_p8  ;;  %s25_s29 = ssub.s32 %s2482_s18, %s2575_s27 }
  0x11   : > { %s2371_s30 = scalar_lea.vmem %s164_s25, 1024  ;;  %p2379_p5 = scmp.lt.s32.totalorder %s164_s25, %s164_s25 }
  0x12   : > { %p2570_p11 = pnand %p2260_p9, %p2920_p1  ;;  %p2372_p13 = scmp.ne.s32.totalorder %s164_s25, %s2371_s30 }
  0x13   : > { %p2380_p7 = scmp.lt.s32.totalorder %s2371_s30, %s2371_s30 }
  0x14   : > { %p2362_p12 = pneg %p2570_p11 }
  0x15   : > { %p2381_p10 = por %p2380_p7, %p2379_p5 }
  0x16   : > { %p2374_p0 = pnand %p2372_p13, %p2362_p12 }
  0x18   : > { %p2375_p3 = pneg %p2374_p0 }
  0x1a   : > { %p2382_p2 = pnand %p2381_p10, %p2375_p3 }
  0x1c   : > { %2385 = shalt.err (!%p2382_p2)
}
  0x1d   : > { %s2485_s5 = smov 128   ;;  %s2486_s6 = smov 8  }
  0x1e   : > { %2263 = dma.hbm_to_vmem [thread:$0]  (!%p2570_p11), %s2918_s3, 1024, %s164_s25, [#allocation6], %s2485_s5, %s2485_s5, %s2486_s6  }
  0x1f   : > { %p26_p2 = scmp.eq.s32.totalorder %s25_s29, 0  ;;  %p35_p9 = scmp.ne.s32.totalorder %s2478_s17, %s2474_s16 }
  0x20   : > { %p36_p10 = scmp.eq.s32.totalorder %s2482_s18, 0  ;;  %p2273_p12 = scmp.lt.s32.totalorder %s2482_s18, 2 }
  0x21   : > { %s2595_s9 = scalar_select %p26_p2, %s2478_s17, %s28_s28  }
  0x22   : > { %p37_p13 = por %p36_p10, %p35_p9  ;;  %p2928_p0 = scmp.eq.s32.totalorder %s2542_s19, 1 }
  0x23   : > { %s177_s11 = sand.u32 1, %s2478_s17   ;;  %s2094_s12 = sshll.u32 %s2482_s18, 9 }
  0x24   : > { %p2599_p3 = por %p2928_p0, %p35_p9  ;;  %s2048_s13 = sshll.u32 %s177_s11, 5 }
  0x25   : > { %s2608_s24 = scalar_lea.hbm %s2915_s0, %s2094_s12  ;;  %s181_s25 = scalar_lea.vmem [#allocation2], %s2048_s13 }
  0x26   : > { %s2929_s10 = scalar_select %p2599_p3, 1, 0 }
  0x27   : > { %s188_s26 = sshll.u32 %s181_s25, 4  ;;  %p2610_p11 = pnand %p2273_p12, %p37_p13  ;;  %s2614_s26 = int_to_ptr.vmem [resolvable:$true] %s188_s26 }
  0x28   : > { %s2616_s29 = scalar_lea.sflag [#allocation3], %s177_s11  ;;  %s2386_s30 = scalar_lea.hbm %s2608_s24, 512 }
  0x29   : > { %p2387_p5 = scmp.ne.s32.totalorder %s2608_s24, %s2386_s30  ;;  %p2388_p7 = pneg %p2610_p11 }
  0x2a   : > { %s2391_s12 = scalar_lea.hbm %s2915_s0, 1024  ;;  %p2392_p10 = scmp.lt.s32.totalorder %s2608_s24, %s2915_s0 }
  0x2b   : > { %p2389_p2 = pnand %p2388_p7, %p2387_p5  ;;  %p2393_p12 = scmp.lt.s32.totalorder %s2391_s12, %s2386_s30 }
  0x2d   : > { %p2390_p9 = pneg %p2389_p2  ;;  %p2394_p13 = por %p2393_p12, %p2392_p10 }
  0x2f   : > { %p2395_p0 = pnand %p2394_p13, %p2390_p9 }
  0x31   : > { %2398 = shalt.err (!%p2395_p0)
}
  0x32   : > { %s2399_s11 = scalar_lea.vmem %s2614_s26, 512  ;;  %s2487_s20 = smov [#allocation2]  }
  0x33   : > { %p2400_p1 = scmp.ne.s32.totalorder %s2614_s26, %s2399_s11  ;;  %s2404_s25 = sshll.u32 %s2487_s20, 4  ;;  %s2405_s25 = int_to_ptr.vmem [resolvable:$false] %s2404_s25 }
  0x34   : > { %s2406_s7 = scalar_lea.vmem %s2405_s25, 1024  ;;  %p2407_p2 = scmp.lt.s32.totalorder %s2614_s26, %s2405_s25 }
  0x35   : > { %p2402_p6 = pnand %p2400_p1, %p2388_p7  ;;  %p2408_p3 = scmp.lt.s32.totalorder %s2406_s7, %s2399_s11 }
  0x37   : > { %p2403_p5 = pneg %p2402_p6  ;;  %p2409_p4 = por %p2408_p3, %p2407_p2 }
  0x39   : > { %p2410_p8 = pnand %p2409_p4, %p2403_p5 }
  0x3b   : > { %2413 = shalt.err (!%p2410_p8)
}
  0x3c   : > { %2267 = dma.hbm_to_vmem [thread:$0]  (!%p2610_p11), %s2608_s24, 512, %s2614_s26, %s2616_s29, %s2485_s5, %s2485_s5, %s2486_s6  }
  0x3d   : > { %p2931_p1 = scmp.ne.s32.totalorder %s2926_s23, 0 }
  0x3e   : > { %s2643_s30 = sand.u32 (!%p2931_p1), 1, %s2474_s16   ;;  %p2932_p4 = scmp.ne.s32.totalorder (!%p2931_p1), %s2924_s21, 0 }
  0x3f   : > { %216 = sbr.rel (%p2931_p1) target bundleno = 2203 (0x89b), region = 36  ;;  %s2052_s8 = sshll.u32 (!%p2931_p1), %s2643_s30, 5 }
  0x40   : > { %s219_s12 = scalar_lea.sflag (!%p2931_p1), [#allocation3], %s2643_s30  ;;  %s222_s13 = scalar_lea.vmem (!%p2931_p1), [#allocation2], %s2052_s8 }
  0x44   : > { %2457 = dma.done.wait (%p2932_p4), %s219_s12, 512  }
  0x45   : > { %2459 = vsyncadd (%p2932_p4), %s219_s12, 4294966784  ;;  %p2933_p6 = scmp.eq.s32.totalorder %s2542_s19, 0 }
  0x47   : > { %2461 = dma.done.wait (%p2933_p6), [#allocation6], 1024   ;;  %p2934_p8 = pmov %p2933_p6 }
  0x48   : > { %vm287_vm0 = vcmask 261120   ;;  %v286_v0 = vld [vmem:[#allocation5 + $0x18] sm:$0xff]  ;;  %v285_v1 = vld [vmem:[#allocation5 + $0x10] sm:$0xff]  ;;  %v271_v2 = vld [vmem:[%s222_s13] sm:$0xff]  ;;  %v2488_v8 = vmov 0.0   ;;  %vm2489_vm1 = vmmov 0   ;;  %v705_v22 = vlaneseq }
  0x49   : > { %2463 = vsyncadd (%p2934_p8), [#allocation6], 4294966272  ;;  %2144 = vmatprep.subr.mxu0 %v286_v0  ;;  %v284_v3 = vld [vmem:[#allocation5 + $0x8] sm:$0xff]  ;;  %2152 = vmatprep.mubr.msk.f32.mxu0 %vm287_vm0, %v271_v2  ;;  %v283_v4 = vld [vmem:[#allocation5] sm:$0xff]  ;;  %s2490_s21 = smov 96   ;;  %v2491_v21 = vmov 0  }
  0x4a   : > { %2145 = vmatpush3.msra.mxu0 %v286_v0  ;;  %v272_v5 = vld [vmem:[%s222_s13 + $0x8] sm:$0xff]  ;;  %v273_v6 = vld [vmem:[%s222_s13 + $0x10] sm:$0xff]  ;;  %v274_v7 = vld [vmem:[%s222_s13 + $0x18] sm:$0xff]  ;;  %2158 = vmatprep.subr.mxu1 %v2488_v8  ;;  %s2055_s23 = sshll.u32 %s2542_s19, 2  ;;  %v706_v24 = vshrl.u32 %v705_v22, 7  ;;  %vm729_vm7 = vcmask 64512  }
  0x4b   : > { %2146 = vmatprep.subr.mxu0 %v285_v1  ;;  %2160 = vmatprep.mubr.msk.f32.mxu1 %vm2489_vm1, %v2488_v8  ;;  %p261_p3 = scmp.lt.s32.totalorder %s2055_s23, 7  ;;  %s2492_s26 = smov 64   ;;  %vm1924_vm11 = vcmask 253952  }
  0x4c   : > { %2147 = vmatpush3.msra.mxu0 %v285_v1  ;;  %2318 = vset.pattern.permute.xlu0 %v2491_v21  ;;  %v2712_v26 = vsub.s32 0, %v706_v24  ;;  %s2054_s11 = sshll.u32 %s2643_s30, 2  ;;  %s2095_s7 = sshll.u32 %s2542_s19, 6 }
  0x4d   : > { %2148 = vmatprep.subr.mxu0 %v284_v3  ;;  %2319 = vset.pattern.permute.xlu1 %v2491_v21  ;;  %s2951_s23 = smov (!%p261_p3, %s2055_s23), 7  ;;  %s2849_s20 = scalar_lea.vmem [#allocation7], %s2054_s11 }
  0x4e   : > { %2149 = vmatpush3.msra.mxu0 %v284_v3  ;;  %s263_s24 = scalar_lea.vmem %s2916_s1, %s2951_s23  ;;  %s268_s14 = scalar_lea.vmem %s2917_s2, %s2951_s23 }
  0x4f   : > { %2150 = vmatprep.subr.mxu0 %v283_v4  ;;  %v275_v23 = vld [vmem:[%s263_s24] sm:$0x1]  ;;  %v276_v25 = vld [vmem:[%s263_s24 + $0x1] sm:$0x1]  ;;  %v277_v28 = vld [vmem:[%s263_s24 + $0x2] sm:$0x1]  ;;  %s2870_s13 = scalar_lea.hbm %s2919_s4, %s2095_s7 }
  0x50   : > { %2151 = vmatpush3.msra.mxu0 %v283_v4  ;;  %vm279_vm2 = vcmp.gt.f32.partialorder %v275_v23, 0.5  ;;  %vm280_vm3 = vcmp.gt.f32.partialorder %v276_v25, 0.5  ;;  %v278_v31 = vld [vmem:[%s263_s24 + $0x3] sm:$0x1]  ;;  %vm281_vm4 = vcmp.gt.f32.partialorder %v277_v28, 0.5  ;;  %s1943_s25 = sshll.u32 %s2849_s20, 4  ;;  %s2862_s25 = int_to_ptr.vmem [resolvable:$true] %s1943_s25 }
  0x51   : > { %2153 = vmatmul.mubr.msk.f32.vlgmr.msra.gmra.mxu0 %vm287_vm0, %v272_v5  ;;  %2173 = vmatprep.subr.mxu0 %v2488_v8  ;;  %v701_v27 = vsel %vm279_vm2, 1, %v2491_v21  ;;  %v702_v30 = vsel %vm280_vm3, 1, %v2491_v21  ;;  %vm282_vm6 = vcmp.gt.f32.partialorder %v278_v31, 0.5  ;;  %v703_v34 = vsel %vm281_vm4, 1, %v2491_v21  ;;  %v1082_v31 = vld [vmem:[#allocation5 + $0x38] sm:$0xff]  ;;  %s1930_s19 = scalar_lea.sflag [#allocation4], %s2643_s30 }
  0x52   : > { %2155 = vmatprep.mubr.msk.f32.mxu0 %vm287_vm0, %v273_v6  ;;  %v708_v29 = vrot.slane %v701_v27, %v2712_v26  ;;  %v712_v33 = vrot.slane %v702_v30, %v2712_v26  ;;  %v704_v37 = vsel %vm282_vm6, 1, %v2491_v21  ;;  %v716_v41 = vrot.slane %v703_v34, %v2712_v26  ;;  %v1080_v34 = vld [vmem:[#allocation5 + $0x28] sm:$0xff]  ;;  %p2943_p7 = scmp.ne.s32.totalorder %s2929_s10, 0  ;;  %s2493_s23 = smov [#allocation7]  }
  0x53   : > { %v720_v43 = vrot.slane %v704_v37, %v2712_v26  ;;  %s2418_s5 = sshll.u32 %s2493_s23, 4  ;;  %s2419_s5 = int_to_ptr.vmem [resolvable:$false] %s2418_s5 }
  0x54   : > { %vm2715_vm5 = vcmp.eq.s32.totalorder %v708_v29, 1  ;;  %vm2723_vm8 = vcmp.eq.s32.totalorder %v712_v33, 1  ;;  %vm2732_vm9 = vcmp.eq.s32.totalorder %v716_v41, 1  ;;  %v1081_v33 = vld [vmem:[#allocation5 + $0x30] sm:$0xff]  ;;  %s2420_s6 = scalar_lea.vmem %s2419_s5, 128  ;;  %p2421_p12 = scmp.lt.s32.totalorder %s2862_s25, %s2419_s5 }
  0x55   : > { %2156 = vmatmul.mubr.msk.f32.gmra.mxu0 %vm287_vm0, %v274_v7  ;;  %vm2736_vm10 = vcmp.eq.s32.totalorder %v720_v43, 1 }
  0x56   : > { %2175 = vmatprep.mubr.msk.f32.mxu0 %vm2489_vm1, %v2488_v8 }
 0x111   : > { %v2665_v9 = vpop.f32.mrf.mxu0 }
 0x112   : > { %v386_v17 = vmul.f32 0.17677669, %v2665_v9 }
 0x113   : > { %v2667_v10 = vpop.f32.mrf.mxu0 }
 0x114   : > { %390 = vrot.lane.b32.xlu0 %v2667_v10, %s2490_s21  ;;  %v385_v14 = vmul.f32 0.17677669, %v2667_v10 }
 0x115   : > { %v2671_v11 = vpop.f32.mrf.mxu0 }
 0x116   : > { %v388_v19 = vmul.f32 0.17677669, %v2671_v11 }
 0x117   : > { %v2673_v12 = vpop.f32.mrf.mxu0 }
 0x118   : > { %468 = vrot.lane.b32.xlu0 %v2665_v9, %s2490_s21  ;;  %546 = vrot.lane.b32.xlu1 %v2673_v12, %s2490_s21  ;;  %v387_v20 = vmul.f32 0.17677669, %v2673_v12 }
 0x11c   : > { %624 = vrot.lane.b32.xlu1 %v2671_v11, %s2490_s21 }
 0x186   : > { %v391_v13 = vpop.permute.xlu0 %390 }
 0x187   : > { %2159 = vmatpush3.xpose.msk.msra.mxu1 %vm287_vm0, %v391_v13 }
 0x188   : > { %2163 = vmatprep.subr.mxu1 %v2488_v8 }
 0x18a   : > { %v469_v15 = vpop.permute.xlu0 %468  ;;  %2161 = vmatmul.mubr.msk.f32.vlgmr.msra.gmra.mxu1 %vm287_vm0, %v385_v14  ;;  %v547_v16 = vpop.permute.xlu1 %546 }
 0x18b   : > { %2164 = vmatpush3.xpose.msk.msra.mxu1 %vm287_vm0, %v469_v15  ;;  %2165 = vmatprep.mubr.msk.f32.mxu1 %vm2489_vm1, %v2488_v8 }
 0x18c   : > { %2168 = vmatprep.subr.mxu1 %v2488_v8 }
 0x18e   : > { %2166 = vmatmul.mubr.msk.f32.vlgmr.msra.gmra.mxu1 %vm287_vm0, %v386_v17  ;;  %v625_v18 = vpop.permute.xlu1 %624 }
 0x18f   : > { %2169 = vmatpush3.xpose.msk.msra.mxu1 %vm287_vm0, %v547_v16  ;;  %2174 = vmatpush3.xpose.msk.msra.mxu0 %vm287_vm0, %v625_v18 }
 0x190   : > { %2170 = vmatprep.mubr.msk.f32.mxu1 %vm2489_vm1, %v2488_v8  ;;  %2178 = vmatprep.subr.mxu1 %v2488_v8 }
 0x191   : > { %2183 = vmatprep.subr.mxu0 %v2488_v8 }
 0x192   : > { %2171 = vmatmul.mubr.msk.f32.vlgmr.msra.gmra.mxu1 %vm287_vm0, %v387_v20  ;;  %2176 = vmatmul.mubr.msk.f32.vlgmr.msra.gmra.mxu0 %vm287_vm0, %v388_v19 }
 0x193   : > { %2180 = vmatprep.mubr.msk.f32.mxu1 %vm2489_vm1, %v2488_v8  ;;  %2185 = vmatprep.mubr.msk.f32.mxu0 %vm2489_vm1, %v2488_v8 }
 0x24a   : > { %v463_v35 = vpop.f32.mrf.mxu1 }
 0x24b   : > { %v725_v36 = vsel %vm2715_vm5, -1e+09, %v463_v35  ;;  %v1079_v35 = vld [vmem:[#allocation5 + $0x20] sm:$0xff] }
 0x24c   : > { %v2162_v38 = vpop.f32.mrf.mxu1  ;;  %v730_v39 = vsel %vm729_vm7, %v725_v36, -inf }
 0x24d   : > { %731 = vmax.xlane.f32.xlu0 %v730_v39 }
 0x24e   : > { %v541_v42 = vpop.f32.mrf.mxu1 }
 0x24f   : > { %v726_v44 = vsel %vm2723_vm8, -1e+09, %v541_v42 }
 0x250   : > { %v2167_v45 = vpop.f32.mrf.mxu1  ;;  %v733_v46 = vsel %vm729_vm7, %v726_v44, -inf }
 0x251   : > { %734 = vmax.xlane.f32.xlu1 %v733_v46 }
 0x252   : > { %v619_v48 = vpop.f32.mrf.mxu1  ;;  %v697_v49 = vpop.f32.mrf.mxu0 }
 0x253   : > { %v727_v51 = vsel %vm2732_vm9, -1e+09, %v619_v48  ;;  %v728_v55 = vsel %vm2736_vm10, -1e+09, %v697_v49 }
 0x254   : > { %v2172_v52 = vpop.f32.mrf.mxu1  ;;  %v2177_v53 = vpop.f32.mrf.mxu0  ;;  %v736_v54 = vsel %vm729_vm7, %v727_v51, -inf  ;;  %v739_v56 = vsel %vm729_vm7, %v728_v55, -inf }
 0x255   : > { %737 = vmax.xlane.f32.xlu0 %v736_v54 }
 0x259   : > { %740 = vmax.xlane.f32.xlu0 %v739_v56 }
 0x262   : > { %774 = vrot.lane.b32.xlu1 %v2667_v10, %s2492_s26 }
 0x2d6   : > { %v732_v57 = vpop.xlane.xlu0 %731 }
 0x2d7   : > { %v742_v58 = vsub.f32 %v725_v36, %v732_v57 }
 0x2d9   : > { %v746_v59 = vmul.f32 1.442695, %v742_v58 }
 0x2da   : > { %v735_v60 = vpop.xlane.xlu1 %734 }
 0x2db   : > { %2320 = vpow2.f32 %v746_v59  ;;  %v743_v63 = vsub.f32 %v726_v44, %v735_v60 }
 0x2dd   : > { %v748_v2 = vmul.f32 1.442695, %v743_v63 }
 0x2de   : > { %v775_v61 = vpop.permute.xlu1 %774  ;;  %v738_v62 = vpop.xlane.xlu0 %737 }
 0x2df   : > { %2179 = vmatpush3.msra.mxu1 %v775_v61  ;;  %v744_v14 = vsub.f32 %v727_v51, %v738_v62 }
 0x2e0   : > { %2188 = vmatprep.subr.mxu1 %v2488_v8 }
 0x2e1   : > { %v750_v15 = vmul.f32 1.442695, %v744_v14 }
 0x2e2   : > { %v741_v0 = vpop.xlane.xlu0 %740 }
 0x2e3   : > { %v745_v1 = vsub.f32 %v728_v55, %v741_v0 }
 0x2e5   : > { %v752_v3 = vmul.f32 1.442695, %v745_v1 }
 0x2e7   : > { %2322 = vpow2.f32 %v752_v3 }
 0x2e8   : > { %v2321_v4 = vpop.eup %2320  ;;  %2324 = vpow2.f32 %v748_v2 }
 0x2e9   : > { %v754_v5 = vsel %vm729_vm7, %v2321_v4, 0.0  ;;  %2326 = vpow2.f32 %v750_v15 }
 0x2ea   : > { %755 = vadd.xlane.f32.xlu1 %v754_v5 }
 0x2f4   : > { %v2323_v6 = vpop.eup %2322 }
 0x2f5   : > { %v763_v7 = vsel %vm729_vm7, %v2323_v6, 0.0  ;;  %v2325_v10 = vpop.eup %2324 }
 0x2f6   : > { %764 = vadd.xlane.f32.xlu0 %v763_v7  ;;  %v757_v13 = vsel %vm729_vm7, %v2325_v10, 0.0  ;;  %v2327_v16 = vpop.eup %2326 }
 0x2f7   : > { %v760_v17 = vsel %vm729_vm7, %v2327_v16, 0.0 }
 0x2fa   : > { %758 = vadd.xlane.f32.xlu0 %v757_v13 }
 0x2fb   : > { %926 = vrot.lane.b32.xlu1 %v2673_v12, %s2492_s26 }
 0x310   : > { %850 = vrot.lane.b32.xlu0 %v2665_v9, %s2492_s26 }
 0x31f   : > { %761 = vadd.xlane.f32.xlu1 %v760_v17 }
 0x330   : > { %1002 = vrot.lane.b32.xlu1 %v2671_v11, %s2492_s26 }
 0x373   : > { %v756_v18 = vpop.xlane.xlu1 %755 }
 0x374   : > { %2328 = vrcp.f32 %v756_v18 }
 0x377   : > { %v927_v12 = vpop.permute.xlu1 %926 }
 0x37f   : > { %v765_v19 = vpop.xlane.xlu0 %764 }
 0x381   : > { %v2329_v20 = vpop.eup %2328 }
 0x382   : > { %v770_v21 = vmul.f32 %v2329_v20, %v2321_v4 }
 0x383   : > { %v759_v22 = vpop.xlane.xlu0 %758 }
 0x384   : > { %2330 = vrcp.f32 %v759_v22  ;;  %2181 = vmatmul.mubr.msk.f32.vlgmr.msra.gmra.mxu1 %vm729_vm7, %v770_v21 }
 0x385   : > { %2189 = vmatpush3.msra.mxu1 %v927_v12  ;;  %2190 = vmatprep.mubr.msk.f32.mxu1 %vm2489_vm1, %v2488_v8  ;;  %2332 = vrcp.f32 %v765_v19 }
 0x386   : > { %2198 = vmatprep.subr.mxu1 %v1082_v31 }
 0x387   : > { %v851_v9 = vpop.permute.xlu0 %850 }
 0x388   : > { %2184 = vmatpush3.msra.mxu0 %v851_v9 }
 0x389   : > { %2193 = vmatprep.subr.mxu0 %v2488_v8 }
 0x391   : > { %v2331_v23 = vpop.eup %2330 }
 0x392   : > { %v771_v11 = vmul.f32 %v2331_v23, %v2325_v10  ;;  %v2333_v25 = vpop.eup %2332 }
 0x393   : > { %v773_v28 = vmul.f32 %v2333_v25, %v2323_v6 }
 0x394   : > { %2186 = vmatmul.mubr.msk.f32.vlgmr.msra.gmra.mxu0 %vm729_vm7, %v771_v11 }
 0x395   : > { %2195 = vmatprep.mubr.msk.f32.mxu0 %vm2489_vm1, %v2488_v8 }
 0x3a8   : > { %v762_v24 = vpop.xlane.xlu1 %761 }
 0x3a9   : > { %2334 = vrcp.f32 %v762_v24 }
 0x3ac   : > { %v1003_v27 = vpop.permute.xlu1 %1002 }
 0x3ad   : > { %2194 = vmatpush3.msra.mxu0 %v1003_v27 }
 0x3ae   : > { %2196 = vmatmul.mubr.msk.f32.vlgmr.msra.gmra.mxu0 %vm729_vm7, %v773_v28  ;;  %2212 = vmatprep.subr.mxu0 %v2488_v8 }
 0x3af   : > { %2214 = vmatprep.mubr.msk.f32.mxu0 %vm2489_vm1, %v2488_v8 }
 0x3b6   : > { %v2335_v29 = vpop.eup %2334 }
 0x3b7   : > { %v772_v30 = vmul.f32 %v2335_v29, %v2327_v16 }
 0x3b9   : > { %2191 = vmatmul.mubr.msk.f32.vlgmr.msra.gmra.mxu1 %vm729_vm7, %v772_v30  ;;  %v1876_v30 = vld [vmem:[%s268_s14] sm:$0x1] }
 0x3ba   : > { %2199 = vmatpush3.msra.mxu1 %v1082_v31  ;;  %v1877_v31 = vld [vmem:[%s268_s14 + $0x1] sm:$0x1] }
 0x3bb   : > { %2200 = vmatprep.subr.mxu1 %v1081_v33 }
 0x3bc   : > { %2201 = vmatpush3.msra.mxu1 %v1081_v33  ;;  %v1879_v33 = vld [vmem:[%s268_s14 + $0x3] sm:$0x1] }
 0x3bd   : > { %2202 = vmatprep.subr.mxu1 %v1080_v34 }
 0x3be   : > { %2203 = vmatpush3.msra.mxu1 %v1080_v34  ;;  %v1878_v34 = vld [vmem:[%s268_s14 + $0x2] sm:$0x1] }
 0x3bf   : > { %2204 = vmatprep.subr.mxu1 %v1079_v35 }
 0x3c0   : > { %2205 = vmatpush3.msra.mxu1 %v1079_v35 }
 0x3c1   : > { %2227 = vmatprep.subr.mxu1 %v2488_v8 }
 0x444   : > { %v846_v36 = vpop.f32.mrf.mxu1 }
 0x445   : > { %2206 = vmatprep.mubr.msk.f32.mxu1 %vm287_vm0, %v846_v36 }
 0x446   : > { %v2182_v37 = vpop.f32.mrf.mxu1 }
 0x454   : > { %v922_v38 = vpop.f32.mrf.mxu0 }
 0x455   : > { %2207 = vmatmul.mubr.msk.f32.vlgmr.msra.gmra.mxu1 %vm287_vm0, %v922_v38 }
 0x456   : > { %v2187_v39 = vpop.f32.mrf.mxu0 }
 0x46e   : > { %v1074_v41 = vpop.f32.mrf.mxu0 }
 0x470   : > { %v2197_v42 = vpop.f32.mrf.mxu0 }
 0x479   : > { %v998_v43 = vpop.f32.mrf.mxu1 }
 0x47a   : > { %2209 = vmatprep.mubr.msk.f32.mxu1 %vm287_vm0, %v998_v43 }
 0x47b   : > { %v2192_v44 = vpop.f32.mrf.mxu1  ;;  %2210 = vmatmul.mubr.msk.f32.gmra.mxu1 %vm287_vm0, %v1074_v41 }
 0x47c   : > { %2229 = vmatprep.mubr.msk.f32.mxu1 %vm2489_vm1, %v2488_v8 }
 0x515   : > { %v2778_v45 = vpop.f32.mrf.mxu1 }
 0x516   : > { %1263 = vrot.lane.b32.xlu1 %v2778_v45, %s2490_s21  ;;  %v1181_v54 = vmul.f32 0.17677669, %v2778_v45 }
 0x517   : > { %v1161_v46 = vpop.f32.mrf.mxu1 }
 0x518   : > { %1185 = vrot.lane.b32.xlu0 %v1161_v46, %s2490_s21  ;;  %v1180_v52 = vmul.f32 0.17677669, %v1161_v46 }
 0x53b   : > { %v2783_v48 = vpop.f32.mrf.mxu1 }
 0x53c   : > { %1419 = vrot.lane.b32.xlu1 %v2783_v48, %s2490_s21  ;;  %v1183_v56 = vmul.f32 0.17677669, %v2783_v48 }
 0x53d   : > { %v1171_v49 = vpop.f32.mrf.mxu1 }
 0x53e   : > { %1341 = vrot.lane.b32.xlu0 %v1171_v49, %s2490_s21  ;;  %v1182_v58 = vmul.f32 0.17677669, %v1171_v49  ;;  %s2414_s21 = scalar_lea.vmem %s2862_s25, 64 }
 0x53f   : > { %p2415_p11 = scmp.ne.s32.totalorder %s2862_s25, %s2414_s21  ;;  %p2422_p13 = scmp.lt.s32.totalorder %s2420_s6, %s2414_s21 }
 0x541   : > { %p2416_p9 = pnand %p2415_p11, %p2943_p7  ;;  %p2423_p0 = por %p2422_p13, %p2421_p12 }
 0x543   : > { %p2417_p10 = pneg %p2416_p9 }
 0x545   : > { %p2424_p5 = pnand %p2423_p0, %p2417_p10 }
 0x588   : > { %v1264_v53 = vpop.permute.xlu1 %1263 }
 0x58a   : > { %v1186_v51 = vpop.permute.xlu0 %1185 }
 0x58b   : > { %2213 = vmatpush3.xpose.msk.msra.mxu0 %vm287_vm0, %v1186_v51 }
 0x58c   : > { %2217 = vmatprep.subr.mxu0 %v2488_v8 }
 0x58e   : > { %2215 = vmatmul.mubr.msk.f32.vlgmr.msra.gmra.mxu0 %vm287_vm0, %v1180_v52 }
 0x58f   : > { %2218 = vmatpush3.xpose.msk.msra.mxu0 %vm287_vm0, %v1264_v53  ;;  %2219 = vmatprep.mubr.msk.f32.mxu0 %vm2489_vm1, %v2488_v8 }
 0x590   : > { %2222 = vmatprep.subr.mxu0 %v2488_v8 }
 0x592   : > { %2220 = vmatmul.mubr.msk.f32.vlgmr.msra.gmra.mxu0 %vm287_vm0, %v1181_v54 }
 0x593   : > { %2224 = vmatprep.mubr.msk.f32.mxu0 %vm2489_vm1, %v2488_v8 }
 0x5ae   : > { %v1420_v55 = vpop.permute.xlu1 %1419 }
 0x5af   : > { %2228 = vmatpush3.xpose.msk.msra.mxu1 %vm287_vm0, %v1420_v55 }
 0x5b0   : > { %v1342_v57 = vpop.permute.xlu0 %1341  ;;  %2237 = vmatprep.subr.mxu1 %v2488_v8 }
 0x5b1   : > { %2223 = vmatpush3.xpose.msk.msra.mxu0 %vm287_vm0, %v1342_v57 }
 0x5b2   : > { %2230 = vmatmul.mubr.msk.f32.vlgmr.msra.gmra.mxu1 %vm287_vm0, %v1183_v56  ;;  %2232 = vmatprep.subr.mxu0 %v2488_v8 }
 0x5b3   : > { %2239 = vmatprep.mubr.msk.f32.mxu1 %vm2489_vm1, %v2488_v8 }
 0x5b4   : > { %2225 = vmatmul.mubr.msk.f32.vlgmr.msra.gmra.mxu0 %vm287_vm0, %v1182_v58 }
 0x5b5   : > { %2234 = vmatprep.mubr.msk.f32.mxu0 %vm2489_vm1, %v2488_v8 }
 0x64e   : > { %v1258_v59 = vpop.f32.mrf.mxu0 }
 0x64f   : > { %v1496_v60 = vsel %vm2715_vm5, -1e+09, %v1258_v59 }
 0x650   : > { %v2216_v61 = vpop.f32.mrf.mxu0  ;;  %v1500_v62 = vsel %vm729_vm7, %v1496_v60, -inf }
 0x651   : > { %1501 = vmax.xlane.f32.xlu0 %v1500_v62 }
 0x652   : > { %v1336_v63 = vpop.f32.mrf.mxu0 }
 0x653   : > { %v1497_v0 = vsel %vm2723_vm8, -1e+09, %v1336_v63 }
 0x654   : > { %v2221_v1 = vpop.f32.mrf.mxu0  ;;  %v1503_v2 = vsel %vm729_vm7, %v1497_v0, -inf }
 0x655   : > { %1504 = vmax.xlane.f32.xlu1 %v1503_v2 }
 0x666   : > { %1544 = vrot.lane.b32.xlu1 %v1161_v46, %s2492_s26 }
 0x672   : > { %v1492_v3 = vpop.f32.mrf.mxu1 }
 0x673   : > { %v1499_v10 = vsel %vm2736_vm10, -1e+09, %v1492_v3 }
 0x674   : > { %v1414_v4 = vpop.f32.mrf.mxu0  ;;  %v2231_v5 = vpop.f32.mrf.mxu1  ;;  %v1509_v40 = vsel %vm729_vm7, %v1499_v10, -inf }
 0x675   : > { %v1498_v32 = vsel %vm2732_vm9, -1e+09, %v1414_v4 }
 0x676   : > { %v2226_v6 = vpop.f32.mrf.mxu0  ;;  %v1506_v7 = vsel %vm729_vm7, %v1498_v32, -inf }
 0x677   : > { %1507 = vmax.xlane.f32.xlu0 %v1506_v7 }
 0x67b   : > { %1510 = vmax.xlane.f32.xlu0 %v1509_v40 }
 0x6da   : > { %v1502_v13 = vpop.xlane.xlu0 %1501 }
 0x6db   : > { %v1512_v14 = vsub.f32 %v1496_v60, %v1502_v13 }
 0x6dd   : > { %v1516_v15 = vmul.f32 1.442695, %v1512_v14 }
 0x6de   : > { %v1505_v16 = vpop.xlane.xlu1 %1504 }
 0x6df   : > { %2336 = vpow2.f32 %v1516_v15  ;;  %v1513_v19 = vsub.f32 %v1497_v0, %v1505_v16 }
 0x6e1   : > { %v1518_v22 = vmul.f32 1.442695, %v1513_v19 }
 0x6e2   : > { %v1545_v17 = vpop.permute.xlu1 %1544 }
 0x6e3   : > { %2233 = vmatpush3.msra.mxu0 %v1545_v17 }
 0x6e4   : > { %2242 = vmatprep.subr.mxu0 %v2488_v8 }
 0x6ec   : > { %v2337_v47 = vpop.eup %2336 }
 0x6ed   : > { %v1524_v18 = vsel %vm729_vm7, %v2337_v47, 0.0 }
 0x6ee   : > { %1525 = vadd.xlane.f32.xlu1 %v1524_v18 }
 0x6ff   : > { %1696 = vrot.lane.b32.xlu1 %v1171_v49, %s2492_s26 }
 0x700   : > { %v1508_v50 = vpop.xlane.xlu0 %1507 }
 0x701   : > { %v1514_v9 = vsub.f32 %v1498_v32, %v1508_v50 }
 0x703   : > { %v1520_v23 = vmul.f32 1.442695, %v1514_v9 }
 0x704   : > { %v1511_v20 = vpop.xlane.xlu0 %1510 }
 0x705   : > { %v1515_v21 = vsub.f32 %v1499_v10, %v1511_v20 }
 0x707   : > { %v1522_v12 = vmul.f32 1.442695, %v1515_v21 }
 0x709   : > { %2338 = vpow2.f32 %v1522_v12 }
 0x70a   : > { %2340 = vpow2.f32 %v1518_v22 }
 0x70b   : > { %2342 = vpow2.f32 %v1520_v23 }
 0x70c   : > { %2344 = vrcp.f32 %v1876_v30 }
 0x70d   : > { %2346 = vrcp.f32 %v1877_v31 }
 0x70e   : > { %2348 = vrcp.f32 %v1879_v33 }
 0x70f   : > { %2350 = vrcp.f32 %v1878_v34 }
 0x716   : > { %v2339_v11 = vpop.eup %2338 }
 0x717   : > { %v1533_v24 = vsel %vm729_vm7, %v2339_v11, 0.0  ;;  %v2341_v25 = vpop.eup %2340 }
 0x718   : > { %1534 = vadd.xlane.f32.xlu0 %v1533_v24  ;;  %v1527_v27 = vsel %vm729_vm7, %v2341_v25, 0.0  ;;  %v2343_v28 = vpop.eup %2342 }
 0x719   : > { %v1530_v29 = vsel %vm729_vm7, %v2343_v28, 0.0  ;;  %v2345_v35 = vpop.eup %2344 }
 0x71a   : > { %v2347_v36 = vpop.eup %2346 }
 0x71b   : > { %v2349_v37 = vpop.eup %2348 }
 0x71c   : > { %1528 = vadd.xlane.f32.xlu0 %v1527_v27  ;;  %v2351_v38 = vpop.eup %2350 }
 0x723   : > { %1531 = vadd.xlane.f32.xlu1 %v1530_v29 }
 0x732   : > { %1620 = vrot.lane.b32.xlu0 %v2778_v45, %s2492_s26 }
 0x734   : > { %1772 = vrot.lane.b32.xlu1 %v2783_v48, %s2492_s26 }
 0x736   : > { %1886 = vperm.xlu0 %2318, %v2345_v35  }
 0x738   : > { %1895 = vperm.xlu1 %2319, %v2347_v36  }
 0x73a   : > { %1913 = vperm.xlu0 %2318, %v2349_v37  }
 0x73c   : > { %1904 = vperm.xlu1 %2319, %v2351_v38  }
 0x777   : > { %v1526_v39 = vpop.xlane.xlu1 %1525 }
 0x778   : > { %2352 = vrcp.f32 %v1526_v39 }
 0x77b   : > { %v1697_v43 = vpop.permute.xlu1 %1696 }
 0x785   : > { %v2353_v41 = vpop.eup %2352 }
 0x786   : > { %v1540_v42 = vmul.f32 %v2353_v41, %v2337_v47 }
 0x788   : > { %2235 = vmatmul.mubr.msk.f32.vlgmr.msra.gmra.mxu0 %vm729_vm7, %v1540_v42 }
 0x789   : > { %2243 = vmatpush3.msra.mxu0 %v1697_v43  ;;  %2244 = vmatprep.mubr.msk.f32.mxu0 %vm2489_vm1, %v2488_v8 }
 0x7a1   : > { %v1535_v44 = vpop.xlane.xlu0 %1534 }
 0x7a5   : > { %v1529_v45 = vpop.xlane.xlu0 %1528 }
 0x7a6   : > { %2354 = vrcp.f32 %v1529_v45 }
 0x7a7   : > { %2356 = vrcp.f32 %v1535_v44 }
 0x7a9   : > { %v1621_v46 = vpop.permute.xlu0 %1620 }
 0x7aa   : > { %2238 = vmatpush3.msra.mxu1 %v1621_v46 }
 0x7ab   : > { %2247 = vmatprep.subr.mxu1 %v2488_v8 }
 0x7ac   : > { %v1532_v48 = vpop.xlane.xlu1 %1531 }
 0x7ad   : > { %2358 = vrcp.f32 %v1532_v48 }
 0x7b0   : > { %v1773_v53 = vpop.permute.xlu1 %1772 }
 0x7b1   : > { %v1887_v63 = vpop.permute.xlu0 %1886 }
 0x7b3   : > { %v2355_v49 = vpop.eup %2354 }
 0x7b4   : > { %v1541_v51 = vmul.f32 %v2355_v49, %v2341_v25  ;;  %v2357_v52 = vpop.eup %2356  ;;  %v1896_v17 = vpop.permute.xlu1 %1895 }
 0x7b5   : > { %v1543_v54 = vmul.f32 %v2357_v52, %v2339_v11  ;;  %v1901_v12 = vrot.slane %v1896_v17, %v2712_v26  ;;  %v1914_v23 = vpop.permute.xlu0 %1913 }
 0x7b6   : > { %2240 = vmatmul.mubr.msk.f32.vlgmr.msra.gmra.mxu1 %vm729_vm7, %v1541_v51  ;;  %v1919_v29 = vrot.slane %v1914_v23, %v2712_v26 }
 0x7b7   : > { %2248 = vmatpush3.msra.mxu1 %v1773_v53  ;;  %2249 = vmatprep.mubr.msk.f32.mxu1 %vm2489_vm1, %v2488_v8  ;;  %v1892_v8 = vrot.slane %v1887_v63, %v2712_v26 }
 0x7b8   : > { %v1905_v31 = vpop.permute.xlu1 %1904 }
 0x7b9   : > { %v1910_v37 = vrot.slane %v1905_v31, %v2712_v26 }
 0x7ba   : > { %v2359_v55 = vpop.eup %2358  ;;  %2250 = vmatmul.mubr.msk.f32.vlgmr.msra.gmra.mxu1 %vm729_vm7, %v1543_v54 }
 0x7bb   : > { %v1542_v56 = vmul.f32 %v2359_v55, %v2343_v28 }
 0x7bd   : > { %2245 = vmatmul.mubr.msk.f32.vlgmr.msra.gmra.mxu0 %vm729_vm7, %v1542_v56 }
 0x848   : > { %v1616_v57 = vpop.f32.mrf.mxu0 }
 0x849   : > { %v1848_v58 = vsel %vm287_vm0, %v1616_v57, 0.0 }
 0x84a   : > { %v1849_v59 = vrot.slane %v1848_v58, 4  ;;  %v2236_v60 = vpop.f32.mrf.mxu0 }
 0x84c   : > { %v1850_v61 = vadd.f32 %v1849_v59, %v1848_v58 }
 0x84e   : > { %v1851_v62 = vrot.slane %v1850_v61, 2 }
 0x850   : > { %v1852_v0 = vadd.f32 %v1851_v62, %v1850_v61 }
 0x852   : > { %v1853_v1 = vrot.slane %v1852_v0, 1 }
 0x854   : > { %v1854_v2 = vadd.f32 %v1853_v1, %v1852_v0 }
 0x856   : > { %v1920_v3 = vmul.f32 %v1892_v8, %v1854_v2 }
 0x858   : > { %1925 = vst.msk [vmem:[%s2849_s20] sm:$0x1] %vm1924_vm11, %v1920_v3 }
 0x876   : > { %v1692_v4 = vpop.f32.mrf.mxu1 }
 0x877   : > { %v1855_v5 = vsel %vm287_vm0, %v1692_v4, 0.0 }
 0x878   : > { %v1856_v32 = vrot.slane %v1855_v5, 4  ;;  %v2241_v6 = vpop.f32.mrf.mxu1 }
 0x87a   : > { %v1857_v7 = vadd.f32 %v1856_v32, %v1855_v5  ;;  %v1844_v10 = vpop.f32.mrf.mxu1 }
 0x87b   : > { %v1869_v40 = vsel %vm287_vm0, %v1844_v10, 0.0 }
 0x87c   : > { %v1858_v13 = vrot.slane %v1857_v7, 2  ;;  %v1870_v14 = vrot.slane %v1869_v40, 4  ;;  %v2251_v15 = vpop.f32.mrf.mxu1 }
 0x87d   : > { %v1768_v16 = vpop.f32.mrf.mxu0 }
 0x87e   : > { %v1859_v47 = vadd.f32 %v1858_v13, %v1857_v7  ;;  %v1871_v18 = vadd.f32 %v1870_v14, %v1869_v40  ;;  %v1862_v50 = vsel %vm287_vm0, %v1768_v16, 0.0 }
 0x87f   : > { %v1863_v19 = vrot.slane %v1862_v50, 4  ;;  %v2246_v20 = vpop.f32.mrf.mxu0 }
 0x880   : > { %v1860_v21 = vrot.slane %v1859_v47, 1  ;;  %v1872_v22 = vrot.slane %v1871_v18, 2 }
 0x881   : > { %v1864_v9 = vadd.f32 %v1863_v19, %v1862_v50 }
 0x882   : > { %v1873_v11 = vadd.f32 %v1872_v22, %v1871_v18  ;;  %v1861_v24 = vadd.f32 %v1860_v21, %v1859_v47 }
 0x883   : > { %v1865_v25 = vrot.slane %v1864_v9, 2 }
 0x884   : > { %v1874_v27 = vrot.slane %v1873_v11, 1  ;;  %v1921_v28 = vmul.f32 %v1901_v12, %v1861_v24 }
 0x885   : > { %v1866_v30 = vadd.f32 %v1865_v25, %v1864_v9 }
 0x886   : > { %1926 = vst.msk [vmem:[%s2849_s20 + $0x1] sm:$0x1] %vm1924_vm11, %v1921_v28  ;;  %v1875_v33 = vadd.f32 %v1874_v27, %v1873_v11 }
 0x887   : > { %v1867_v34 = vrot.slane %v1866_v30, 1 }
 0x888   : > { %v1923_v35 = vmul.f32 %v1919_v29, %v1875_v33 }
 0x889   : > { %v1868_v36 = vadd.f32 %v1867_v34, %v1866_v30 }
 0x88a   : > { %1928 = vst.msk [vmem:[%s2849_s20 + $0x3] sm:$0x1] %vm1924_vm11, %v1923_v35 }
 0x88b   : > { %v1922_v38 = vmul.f32 %v1910_v37, %v1868_v36 }
 0x88d   : > { %1927 = vst.msk [vmem:[%s2849_s20 + $0x2] sm:$0x1] %vm1924_vm11, %v1922_v38 }
 0x88e   : > { %2427 = shalt.err (!%p2424_p5)
}
 0x88f   : > { %s2428_s24 = scalar_lea.hbm %s2870_s13, 64  ;;  %s2432_s29 = scalar_lea.hbm %s2919_s4, 128 }
 0x890   : > { %p2429_p2 = scmp.ne.s32.totalorder %s2870_s13, %s2428_s24  ;;  %p2433_p6 = scmp.lt.s32.totalorder %s2870_s13, %s2919_s4 }
 0x891   : > { %p2434_p8 = scmp.lt.s32.totalorder %s2432_s29, %s2428_s24 }
 0x892   : > { %p2430_p1 = pnand %p2429_p2, %p2943_p7 }
 0x893   : > { %p2435_p3 = por %p2434_p8, %p2433_p6 }
 0x894   : > { %p2431_p4 = pneg %p2430_p1 }
 0x896   : > { %p2436_p11 = pnand %p2435_p3, %p2431_p4 }
 0x898   : > { %2439 = shalt.err (!%p2436_p11)
}
 0x899   : > { %s2494_s20 = smov 16   ;;  %s2495_s7 = smov 1  }
 0x89a   : > { %2258 = dma.vmem_to_hbm [thread:$0]  (%p2943_p7), %s2862_s25, 64, %s2870_s13, %s1930_s19, %s2494_s20, %s2494_s20, %s2495_s7  }
 0x89b PF: > { %s1958_s8 = sand.u32 1, %s2470_s15   ;;  %p2944_p9 = scmp.ne.s32.totalorder %s2925_s22, 0 }
 0x89c   : > { %p2945_p10 = scmp.ge.s32.totalorder %s2482_s18, 2  ;;  %s1959_s12 = scalar_lea.sflag [#allocation4], %s1958_s8 }
 0x89e   : > { %p2269_p12 = pnand %p2945_p10, %p2944_p9 }
 0x8a0   : > { %p2270_p13 = pneg %p2269_p12 }
 0x8a2   : > { %2465 = dma.done.wait (%p2270_p13), %s1959_s12, 64  }
 0x8a3   : > { %2467 = vsyncadd (%p2270_p13), %s1959_s12, 4294967232  ;;  %p18_p0 = scmp.ge.s32.totalorder %s2575_s27, 4   ;;  %s2946_s15 = smov %s2474_s16 }
 0x8a4   : > { %s2947_s16 = smov %s2478_s17  ;;  %s2948_s17 = smov %s2595_s9 }
 0x8a5   : > { %s2949_s18 = smov %s2575_s27  ;;  %20 = sbr.rel (!%p18_p0) target bundleno = 6 (0x6), region = 92 }
 0x8aa   :  { %1964 = vsyncpa [#allocation3], 1 }
 0x8ab   :  { %1966 = vsyncpa [#allocation3 + $0x1], 1 }
 0x8ac   :  { %1967 = vsyncpa [#allocation6], 1 }
 0x8ad   :  { %1968 = vsyncpa [#allocation4], 1 }
 0x8ae   :  { %1970 = vsyncpa [#allocation4 + $0x1], 1 }

</bundles_post_ra>
